<compile_context>
chip_gen: v6e
topology: v6e:2x2x1
jax: 0.10.0
libtpu: 0.0.40
codegen_flags: <defaults>
</compile_context>

<pallas_src>
import functools

import jax
import jax.numpy as jnp
from jax.experimental import pallas as pl
from jax.experimental.pallas import tpu as pltpu


# ---------------------------------------------------------------------------
# Single-pass kernel: whole (bt, T, C) row-group resident in VMEM.
# ---------------------------------------------------------------------------
def grn_kernel(x_ref, gamma_ref, beta_ref, o_ref, *, t_chunk):
    bt, t_total, c = x_ref.shape
    nfull = t_total // t_chunk
    rem = t_total - nfull * t_chunk

    def sq_sum(xc):
        xc32 = xc.astype(jnp.float32)
        return jnp.sum(xc32 * xc32, axis=1, keepdims=True)       # (bt,1,c) f32

    # Pass 1: sum of squares over T, chunked -> no full-tile f32 copy is live.
    acc = jnp.zeros((bt, 1, c), jnp.float32)
    if nfull > 0:
        def red_body(i, a):
            start = pl.multiple_of(i * t_chunk, t_chunk)
            return a + sq_sum(x_ref[:, pl.ds(start, t_chunk), :])
        acc = jax.lax.fori_loop(0, nfull, red_body, acc)
    if rem > 0:
        acc = acc + sq_sum(x_ref[:, pl.ds(nfull * t_chunk, rem), :])

    gx = jnp.sqrt(acc)                                            # (bt,1,c)
    gx_mean = jnp.sum(gx, axis=-1, keepdims=True) * (1.0 / c)     # (bt,1,1)
    nx = gx * pl.reciprocal(gx_mean + 1e-6)                       # exact recip
    scale = gamma_ref[...].astype(jnp.float32) * nx + 1.0         # (bt,1,c) f32
    beta = beta_ref[...].astype(jnp.float32)                      # (1,1,c) f32

    def apply(xc):
        # f32 FMA per chunk; cast only the final result (bf16-safe).
        return (xc.astype(jnp.float32) * scale + beta).astype(o_ref.dtype)

    # Pass 2: folded epilogue out = x * (gamma*nx + 1) + beta, chunked over T.
    if nfull > 0:
        @pl.loop(0, nfull)
        def _(i):
            start = pl.multiple_of(i * t_chunk, t_chunk)
            o_ref[:, pl.ds(start, t_chunk), :] = apply(
                x_ref[:, pl.ds(start, t_chunk), :])
    if rem > 0:
        start = nfull * t_chunk
        o_ref[:, pl.ds(start, rem), :] = apply(x_ref[:, pl.ds(start, rem), :])


# ---------------------------------------------------------------------------
# Two-pass fallback kernels (rows too large for VMEM): T-chunked grid.
# ---------------------------------------------------------------------------
def grn_scale_kernel(x_ref, gamma_ref, scale_ref, acc_ref, *, true_t):
    # grid = (B, T_blocks); x_ref: (1, tT, C); scale_ref/acc_ref: (1, 1, C)
    t = pl.program_id(1)

    @pl.when(t == 0)
    def _():
        acc_ref[...] = jnp.zeros_like(acc_ref)

    xc = x_ref[...].astype(jnp.float32)
    t_blk = x_ref.shape[1]
    if true_t % t_blk != 0:
        # Mask Pallas auto-padded trailing T rows (contents are undefined).
        row = t * t_blk + jax.lax.broadcasted_iota(jnp.int32, xc.shape, 1)
        xc = jnp.where(row < true_t, xc, 0.0)
    acc_ref[...] += jnp.sum(xc * xc, axis=1, keepdims=True)

    @pl.when(t == pl.num_programs(1) - 1)
    def _():
        c = scale_ref.shape[-1]
        gx = jnp.sqrt(acc_ref[...])
        gx_mean = jnp.sum(gx, axis=-1, keepdims=True) * (1.0 / c)
        nx = gx * pl.reciprocal(gx_mean + 1e-6)
        scale_ref[...] = gamma_ref[...].astype(jnp.float32) * nx + 1.0


def grn_apply_kernel(x_ref, scale_ref, beta_ref, o_ref):
    x32 = x_ref[...].astype(jnp.float32)
    o_ref[...] = (x32 * scale_ref[...]
                  + beta_ref[...].astype(jnp.float32)).astype(o_ref.dtype)


# ---------------------------------------------------------------------------
# Wrapper
# ---------------------------------------------------------------------------
def _vmem_capacity_bytes():
    try:
        return int(pltpu.get_tpu_info().vmem_capacity_bytes)
    except Exception:
        return 64 * 1024 * 1024  # conservative (v7x-sized) fallback


def grn(x, gamma, beta, *, _force_two_pass=False, _t_block=None):
    """x: (B, T, C); gamma, beta: (1, 1, C).  Returns (B, T, C)."""
    B, T, C = x.shape
    dsize = jnp.dtype(x.dtype).itemsize
    row_bytes = T * C * dsize

    vmem_cap = _vmem_capacity_bytes()
    small_vmem = vmem_cap <= 64 * 1024 * 1024          # v7x-like: 64 MiB, 2 TCs
    if small_vmem:
        tile_budget = 6 * 1024 * 1024
        vmem_limit = 44 * 1024 * 1024
    else:                                              # v5e/v6e: 128 MiB, 1 TC
        tile_budget = 12 * 1024 * 1024
        vmem_limit = 64 * 1024 * 1024

    two_pass = _force_two_pass or (row_bytes > tile_budget)

    if not two_pass:
        # --- single-pass path: as many whole batch rows per step as fit ---
        budget_rows = max(1, tile_budget // max(1, row_bytes))
        bt = max(1, min(B, budget_rows))
        if small_vmem and B >= 2:
            bt = min(bt, pl.cdiv(B, 2))   # keep >=2 grid blocks for both cores
        grid = (pl.cdiv(B, bt),)
        t_chunk = min(T, 256)

        param_bytes = (gamma.size * jnp.dtype(gamma.dtype).itemsize
                       + beta.size * jnp.dtype(beta.dtype).itemsize)
        cost = pl.CostEstimate(
            flops=4 * B * T * C + 6 * B * C,
            transcendentals=B * C + B,
            bytes_accessed=2 * B * T * C * dsize + param_bytes,
        )

        return pl.pallas_call(
            functools.partial(grn_kernel, t_chunk=t_chunk),
            out_shape=jax.ShapeDtypeStruct((B, T, C), x.dtype),
            grid_spec=pltpu.PrefetchScalarGridSpec(
                num_scalar_prefetch=0,
                grid=grid,
                in_specs=[
                    pl.BlockSpec((bt, T, C), lambda b: (b, 0, 0)),
                    pl.BlockSpec((1, 1, C), lambda b: (0, 0, 0)),
                    pl.BlockSpec((1, 1, C), lambda b: (0, 0, 0)),
                ],
                out_specs=pl.BlockSpec((bt, T, C), lambda b: (b, 0, 0)),
            ),
            compiler_params=pltpu.CompilerParams(
                dimension_semantics=("parallel",),
                vmem_limit_bytes=vmem_limit,
            ),
            cost_estimate=cost,
        )(x, gamma, beta)

    # --- two-pass T-chunked fallback (row does not fit in the tile budget) ---
    if _t_block is not None:
        tT = _t_block
    else:
        tT = tile_budget // (C * dsize)
        tT = max(8, (tT // 8) * 8)       # keep the sublane dim a multiple of 8
        tT = min(tT, T)
    grid_t = pl.cdiv(T, tT)

    scale = pl.pallas_call(
        functools.partial(grn_scale_kernel, true_t=T),
        out_shape=jax.ShapeDtypeStruct((B, 1, C), jnp.float32),
        grid_spec=pltpu.PrefetchScalarGridSpec(
            num_scalar_prefetch=0,
            grid=(B, grid_t),
            in_specs=[
                pl.BlockSpec((1, tT, C), lambda b, t: (b, t, 0)),
                pl.BlockSpec((1, 1, C), lambda b, t: (0, 0, 0)),
            ],
            out_specs=pl.BlockSpec((1, 1, C), lambda b, t: (b, 0, 0)),
            scratch_shapes=[pltpu.VMEM((1, 1, C), jnp.float32)],
        ),
        compiler_params=pltpu.CompilerParams(
            dimension_semantics=("parallel", "arbitrary"),
            vmem_limit_bytes=vmem_limit,
        ),
    )(x, gamma)

    return pl.pallas_call(
        grn_apply_kernel,
        out_shape=jax.ShapeDtypeStruct((B, T, C), x.dtype),
        grid_spec=pltpu.PrefetchScalarGridSpec(
            num_scalar_prefetch=0,
            grid=(B, grid_t),
            in_specs=[
                pl.BlockSpec((1, tT, C), lambda b, t: (b, t, 0)),
                pl.BlockSpec((1, 1, C), lambda b, t: (b, 0, 0)),
                pl.BlockSpec((1, 1, C), lambda b, t: (0, 0, 0)),
            ],
            out_specs=pl.BlockSpec((1, tT, C), lambda b, t: (b, t, 0)),
        ),
        compiler_params=pltpu.CompilerParams(
            dimension_semantics=("parallel", "parallel"),
            vmem_limit_bytes=vmem_limit,
        ),
    )(x, scale, beta)


def grn_ref(x, gamma, beta):
    """Pure-JAX reference mirroring the PyTorch forward."""
    gx = jnp.sqrt(jnp.sum(x.astype(jnp.float32) ** 2, axis=1, keepdims=True))
    nx = gx / (jnp.mean(gx, axis=-1, keepdims=True) + 1e-6)
    return (gamma * (x * nx) + beta + x).astype(x.dtype)


if __name__ == "__main__":
    key = jax.random.PRNGKey(0)
    kx, kg, kb, kx2 = jax.random.split(key, 4)

    # Small shape exercising the single-pass path.
    B, T, C = 2, 8, 32
    x = jax.random.normal(kx, (B, T, C), dtype=jnp.float32)
    # nn.Parameter(torch.zeros(...)) initializes to zeros; use small random
    # values instead so the gamma/beta path is actually exercised.
    gamma = 0.1 * jax.random.normal(kg, (1, 1, C), dtype=jnp.float32)
    beta = 0.1 * jax.random.normal(kb, (1, 1, C), dtype=jnp.float32)

    out = grn(x, gamma, beta)
    jax.block_until_ready(out)
    ref = grn_ref(x, gamma, beta)
    assert out.shape == (B, T, C)
    assert jnp.allclose(out, ref, atol=1e-5, rtol=1e-5), "single-pass mismatch"

    # Force the two-pass T-chunked fallback at a small shape; T not a multiple
    # of the T block so the padded-row mask path is exercised too.
    B2, T2, C2 = 2, 20, 32
    x2 = jax.random.normal(kx2, (B2, T2, C2), dtype=jnp.float32)
    out2 = grn(x2, gamma, beta, _force_two_pass=True, _t_block=8)
    jax.block_until_ready(out2)
    ref2 = grn_ref(x2, gamma, beta)
    assert out2.shape == (B2, T2, C2)
    assert jnp.allclose(out2, ref2, atol=1e-5, rtol=1e-5), "two-pass mismatch"

    print("KERNEL_OK")
</pallas_src>

<mosaic_0001>
module attributes {stable_mosaic.version = 11 : i64} {
  func.func @grn_kernel(%arg0: i32, %arg1: memref<1x8x32xf32, #tpu.memory_space<vmem>>, %arg2: memref<1x1x32xf32, #tpu.memory_space<vmem>>, %arg3: memref<1x1x32xf32, #tpu.memory_space<vmem>>, %arg4: memref<1x8x32xf32, #tpu.memory_space<vmem>>) attributes {dimension_semantics = [#tpu.dimension_semantics<parallel>], iteration_bounds = array<i64: 2>, scalar_prefetch = 0 : i64, scratch_operands = 0 : i64, tpu.core_type = #tpu.core_type<tc>, window_params = [{transform_indices = @transform_0, window_bounds = array<i64: 1, 8, 32>}, {pipeline_mode = #tpu.pipeline_mode<synchronous>, transform_indices = @transform_1, window_bounds = array<i64: 1, 1, 32>}, {pipeline_mode = #tpu.pipeline_mode<synchronous>, transform_indices = @transform_2, window_bounds = array<i64: 1, 1, 32>}, {transform_indices = @transform_3, window_bounds = array<i64: 1, 8, 32>}]} {
    %cst = arith.constant 0.000000e+00 : f32
    %0 = vector.broadcast %cst : f32 to vector<1x1x32xf32>
    %c0_i32 = arith.constant 0 : i32
    %c8_i32 = arith.constant 8 : i32
    %1 = arith.muli %c0_i32, %c8_i32 : i32
    %2 = tpu.assume_multiple %1, 8 : i32
    %c0 = arith.constant 0 : index
    %3 = arith.index_cast %2 : i32 to index
    %c0_0 = arith.constant 0 : index
    %4 = vector.load %arg1[%c0, %3, %c0_0] : memref<1x8x32xf32, #tpu.memory_space<vmem>>, vector<1x8x32xf32>
    %5 = arith.mulf %4, %4 : vector<1x8x32xf32>
    %cst_1 = arith.constant dense<0.000000e+00> : vector<1x32xf32>
    %6 = vector.multi_reduction <add>, %5, %cst_1 [1] : vector<1x8x32xf32> to vector<1x32xf32>
    %7 = vector.shape_cast %6 : vector<1x32xf32> to vector<1x1x32xf32>
    %8 = arith.addf %0, %7 : vector<1x1x32xf32>
    %c1_i32 = arith.constant 1 : i32
    %9 = math.sqrt %8 : vector<1x1x32xf32>
    %cst_2 = arith.constant dense<0.000000e+00> : vector<1x1xf32>
    %10 = vector.multi_reduction <add>, %9, %cst_2 [2] : vector<1x1x32xf32> to vector<1x1xf32>
    %11 = vector.shape_cast %10 : vector<1x1xf32> to vector<1x1x1xf32>
    %cst_3 = arith.constant 3.125000e-02 : f32
    %12 = vector.broadcast %cst_3 : f32 to vector<1x1x1xf32>
    %13 = arith.mulf %11, %12 : vector<1x1x1xf32>
    %cst_4 = arith.constant 9.99999997E-7 : f32
    %14 = vector.broadcast %cst_4 : f32 to vector<1x1x1xf32>
    %15 = arith.addf %13, %14 : vector<1x1x1xf32>
    %16 = tpu.reciprocal %15 : vector<1x1x1xf32> -> vector<1x1x1xf32>
    %17 = vector.broadcast %16 : vector<1x1x1xf32> to vector<1x1x32xf32>
    %18 = arith.mulf %9, %17 : vector<1x1x32xf32>
    %c0_5 = arith.constant 0 : index
    %c0_6 = arith.constant 0 : index
    %c0_7 = arith.constant 0 : index
    %19 = vector.load %arg2[%c0_5, %c0_6, %c0_7] : memref<1x1x32xf32, #tpu.memory_space<vmem>>, vector<1x1x32xf32>
    %20 = arith.mulf %19, %18 : vector<1x1x32xf32>
    %cst_8 = arith.constant 1.000000e+00 : f32
    %21 = vector.broadcast %cst_8 : f32 to vector<1x1x32xf32>
    %22 = arith.addf %20, %21 : vector<1x1x32xf32>
    %c0_9 = arith.constant 0 : index
    %c0_10 = arith.constant 0 : index
    %c0_11 = arith.constant 0 : index
    %23 = vector.load %arg3[%c0_9, %c0_10, %c0_11] : memref<1x1x32xf32, #tpu.memory_space<vmem>>, vector<1x1x32xf32>
    %c0_i32_12 = arith.constant 0 : i32
    %c1_i32_13 = arith.constant 1 : i32
    %24 = arith.muli %c0_i32_12, %c1_i32_13 : i32
    %c0_i32_14 = arith.constant 0 : i32
    %25 = arith.addi %c0_i32_14, %24 : i32
    %c8_i32_15 = arith.constant 8 : i32
    %26 = arith.muli %25, %c8_i32_15 : i32
    %27 = tpu.assume_multiple %26, 8 : i32
    %c0_16 = arith.constant 0 : index
    %28 = arith.index_cast %27 : i32 to index
    %c0_17 = arith.constant 0 : index
    %29 = vector.load %arg1[%c0_16, %28, %c0_17] : memref<1x8x32xf32, #tpu.memory_space<vmem>>, vector<1x8x32xf32>
    %30 = vector.broadcast %22 : vector<1x1x32xf32> to vector<1x8x32xf32>
    %31 = arith.mulf %29, %30 : vector<1x8x32xf32>
    %32 = vector.broadcast %23 : vector<1x1x32xf32> to vector<1x8x32xf32>
    %33 = arith.addf %31, %32 : vector<1x8x32xf32>
    %c0_18 = arith.constant 0 : index
    %34 = arith.index_cast %27 : i32 to index
    %c0_19 = arith.constant 0 : index
    %35 = vector.load %arg4[%c0_18, %34, %c0_19] : memref<1x8x32xf32, #tpu.memory_space<vmem>>, vector<1x8x32xf32>
    tpu.vector_store %arg4[%c0_18, %34, %c0_19], %33 {strides = array<i32>} : memref<1x8x32xf32, #tpu.memory_space<vmem>>, vector<1x8x32xf32>,
    %c1_i32_20 = arith.constant 1 : i32
    return
  }
  func.func @transform_0(%arg0: i32) -> (i32, i32, i32) {
    %c0_i32 = arith.constant 0 : i32
    %c0_i32_0 = arith.constant 0 : i32
    %c0_i32_1 = arith.constant 0 : i32
    return %arg0, %c0_i32, %c0_i32_0 : i32, i32, i32
  }
  func.func @transform_1(%arg0: i32) -> (i32, i32, i32) {
    %c0_i32 = arith.constant 0 : i32
    %c0_i32_0 = arith.constant 0 : i32
    %c0_i32_1 = arith.constant 0 : i32
    %c0_i32_2 = arith.constant 0 : i32
    return %c0_i32, %c0_i32_0, %c0_i32_1 : i32, i32, i32
  }
  func.func @transform_2(%arg0: i32) -> (i32, i32, i32) {
    %c0_i32 = arith.constant 0 : i32
    %c0_i32_0 = arith.constant 0 : i32
    %c0_i32_1 = arith.constant 0 : i32
    %c0_i32_2 = arith.constant 0 : i32
    return %c0_i32, %c0_i32_0, %c0_i32_1 : i32, i32, i32
  }
  func.func @transform_3(%arg0: i32) -> (i32, i32, i32) {
    %c0_i32 = arith.constant 0 : i32
    %c0_i32_0 = arith.constant 0 : i32
    %c0_i32_1 = arith.constant 0 : i32
    return %arg0, %c0_i32, %c0_i32_0 : i32, i32, i32
  }
}

</mosaic_0001>

<bundles_post_ra>
// kernel: tpu_custom_call.1
= control target key start
LH: loop header
LB: loop body
LE: loop exit
PB: predicated region body
PF: predicated region fallthrough
CT: control target
= control target key end

     0   :  { %8 = vsyncpa [#allocation3], 0  ;;  %s647_s0 = inlined_call_operand.hbm [shape: f32[2,8,32], index: 0, kind: input, shape index: {}]   ;;  %s648_s1 = inlined_call_operand.vmem [shape: f32[1,1,32], index: 1, kind: input, shape index: {}]   ;;  %s649_s2 = inlined_call_operand.vmem [shape: f32[1,1,32], index: 2, kind: input, shape index: {}]   ;;  %s650_s3 = inlined_call_operand.hbm [shape: f32[2,8,32], index: 3, kind: output, shape index: {}]  }
   0x1   :  { %10 = vsyncpa [#allocation3 + $0x1], 0 }
   0x2   :  { %11 = vsyncpa [#allocation4], 0 }
   0x3   :  { %13 = vsyncpa [#allocation4 + $0x1], 0  ;;  %s493_s12 = smov 0   ;;  %s495_s13 = smov 0  }
   0x4   :  { %s497_s14 = smov 0   ;;  %s499_s15 = smov 0  }
   0x5 LB: > { %s514_s16 = sadd.s32 4294967295, %s469_s15   ;;  %s314_s17 = sadd.s32 4294967294, %s469_s15   ;;  %s469_s15 = sphi %s499_s15, %s667_s15   ;;  %s465_s14 = sphi %s497_s14, %s666_s14   ;;  %s461_s13 = sphi %s495_s13, %s665_s13   ;;  %s457_s12 = sphi %s493_s12, %s664_s12  }
   0x6   : > { %s518_s18 = sadd.s32 1, %s469_s15   ;;  %s26_s19 = sadd.s32 1, %s465_s14 }
   0x7   : > { %s23_s20 = ssub.s32 %s469_s15, %s518_s18  ;;  %p33_p0 = scmp.ne.s32.totalorder %s465_s14, %s461_s13 }
   0x8   : > { %p24_p1 = scmp.eq.s32.totalorder %s23_s20, 0  ;;  %p34_p2 = scmp.eq.s32.totalorder %s469_s15, 0 }
   0x9   : > { %p39_p3 = scmp.ne.s32.totalorder %s461_s13, %s457_s12  ;;  %p40_p4 = scmp.eq.s32.totalorder %s514_s16, 0 }
   0xa   : > { %s530_s21 = scalar_select %p24_p1, %s465_s14, %s26_s19  }
   0xb   : > { %p532_p5 = por %p34_p2, %p33_p0  ;;  %p536_p6 = por %p40_p4, %p39_p3 }
   0xc   : > { %p105_p7 = scmp.eq.s32.totalorder %s514_s16, 1  ;;  %p111_p8 = scmp.eq.s32.totalorder %s314_s17, 1 }
   0xd   : > { %s654_s23 = scalar_select %p536_p6, 1, 0 }
   0xe   : > { %p339_p10 = scmp.lt.s32.totalorder %s469_s15, 2  ;;  %p543_p11 = por %p105_p7, %p33_p0 }
   0xf   : > { %p547_p12 = por %p111_p8, %p39_p3  ;;  %s137_s26 = sand.u32 1, %s465_s14  }
  0x10   : > { %s655_s24 = scalar_select %p543_p11, 1, 0 }
  0x11   : > { %s656_s25 = scalar_select %p547_p12, 1, 0 }
  0x12   : > { %s318_s27 = sshll.u32 %s469_s15, 7  ;;  %s317_s28 = sshll.u32 %s137_s26, 3 }
  0x13   : > { %s556_s4 = scalar_lea.hbm %s647_s0, %s318_s27  ;;  %s141_s5 = scalar_lea.vmem [#allocation2], %s317_s28 }
  0x14   : > { %s148_s6 = sshll.u32 %s141_s5, 4  ;;  %p560_p13 = pnand %p339_p10, %p532_p5  ;;  %s564_s6 = int_to_ptr.vmem [resolvable:$true] %s148_s6 }
  0x15   : > { %s138_s8 = scalar_lea.sflag [#allocation3], %s137_s26  ;;  %s377_s9 = scalar_lea.hbm %s556_s4, 128 }
  0x16   : > { %p378_p2 = scmp.ne.s32.totalorder %s556_s4, %s377_s9  ;;  %p379_p3 = pneg %p560_p13 }
  0x17   : > { %s382_s17 = scalar_lea.hbm %s647_s0, 256  ;;  %p383_p5 = scmp.lt.s32.totalorder %s556_s4, %s647_s0 }
  0x18   : > { %p380_p4 = pnand %p379_p3, %p378_p2  ;;  %p384_p8 = scmp.lt.s32.totalorder %s382_s17, %s377_s9 }
  0x1a   : > { %p381_p7 = pneg %p380_p4  ;;  %p385_p10 = por %p384_p8, %p383_p5 }
  0x1c   : > { %p386_p9 = pnand %p385_p10, %p381_p7 }
  0x1e   : > { %389 = shalt.err (!%p386_p9)
}
  0x1f   : > { %s390_s22 = scalar_lea.vmem %s564_s6, 128  ;;  %s471_s26 = smov [#allocation2]  }
  0x20   : > { %p391_p0 = scmp.ne.s32.totalorder %s564_s6, %s390_s22  ;;  %s395_s27 = sshll.u32 %s471_s26, 4  ;;  %s396_s27 = int_to_ptr.vmem [resolvable:$false] %s395_s27 }
  0x21   : > { %s397_s28 = scalar_lea.vmem %s396_s27, 256  ;;  %p398_p4 = scmp.lt.s32.totalorder %s564_s6, %s396_s27 }
  0x22   : > { %p393_p1 = pnand %p391_p0, %p379_p3  ;;  %p399_p12 = scmp.lt.s32.totalorder %s397_s28, %s390_s22 }
  0x24   : > { %p394_p2 = pneg %p393_p1  ;;  %p400_p11 = por %p399_p12, %p398_p4 }
  0x26   : > { %p401_p6 = pnand %p400_p11, %p394_p2 }
  0x28   : > { %404 = shalt.err (!%p401_p6)
}
  0x29   : > { %334 = dma.hbm_to_vmem [thread:$0]  (!%p560_p13), %s556_s4, 128, %s564_s6, %s138_s8  }
  0x2a   : > { %p658_p9 = scmp.lt.s32.totalorder %s469_s15, 3  ;;  %p659_p7 = scmp.ge.s32.totalorder %s469_s15, 1 }
  0x2c   : > { %p154_p0 = pnand %p659_p7, %p658_p9 }
  0x2d   : > { %s591_s29 = sand.u32 (!%p154_p0), 1, %s461_s13   ;;  %p660_p6 = scmp.ne.s32.totalorder (!%p154_p0), %s654_s23, 0 }
  0x2e   : > { %157 = sbr.rel (%p154_p0) target bundleno = 268 (0x10c), region = 32  ;;  %s320_s30 = sshll.u32 (!%p154_p0), %s591_s29, 3 }
  0x2f   : > { %s160_s5 = scalar_lea.sflag (!%p154_p0), [#allocation3], %s591_s29  ;;  %s163_s7 = scalar_lea.vmem (!%p154_p0), [#allocation2], %s320_s30 }
  0x33   : > { %448 = dma.done.wait (%p660_p6), %s160_s5, 128  }
  0x34   : > { %450 = vsyncadd (%p660_p6), %s160_s5, 4294967168  ;;  %v186_v0 = vld [vmem:[%s163_s7] sm:$0xff]  ;;  %vm188_vm0 = vcmask 261120   ;;  %v216_v18 = vlaneseq  ;;  %s324_s9 = sshll.u32 %s514_s16, 7  ;;  %s185_s10 = scalar_lea.vmem [#allocation5], %s320_s30 }
  0x35   : > { %v187_v1 = vmul.f32 %v186_v0, %v186_v0  ;;  %v211_v21 = vld [vmem:[%s648_s1] sm:$0x1]  ;;  %s244_s11 = sshll.u32 %s185_s10, 4  ;;  %s242_s20 = scalar_lea.hbm %s650_s3, %s324_s9  ;;  %s245_s11 = int_to_ptr.vmem [resolvable:$true] %s244_s11 }
  0x36   : > { %v217_v19 = vshrl.u32 %v216_v18, 7  ;;  %v322_v27 = vld [vmem:[%s649_s2] ss:$0 sm:$0xff]  ;;  %s231_s22 = scalar_lea.sflag [#allocation4], %s591_s29  ;;  %s405_s26 = scalar_lea.vmem %s245_s11, 128 }
  0x37   : > { %v189_v2 = vsel %vm188_vm0, %v187_v1, 0.0  ;;  %p406_p11 = scmp.ne.s32.totalorder %s245_s11, %s405_s26  ;;  %p661_p12 = scmp.ne.s32.totalorder %s655_s24, 0 }
  0x38   : > { %v190_v3 = vrot.slane %v189_v2, 4  ;;  %v218_v24 = vsub.s32 0, %v217_v19  ;;  %s472_s27 = smov [#allocation5]  }
  0x39   : > { %p407_p13 = pnand %p406_p11, %p661_p12  ;;  %s409_s16 = sshll.u32 %s472_s27, 4  ;;  %s410_s16 = int_to_ptr.vmem [resolvable:$false] %s409_s16 }
  0x3a   : > { %v191_v4 = vadd.f32 %v190_v3, %v189_v2  ;;  %s411_s28 = scalar_lea.vmem %s410_s16, 256  ;;  %p412_p3 = scmp.lt.s32.totalorder %s245_s11, %s410_s16 }
  0x3b   : > { %p408_p1 = pneg %p407_p13  ;;  %p413_p5 = scmp.lt.s32.totalorder %s411_s28, %s405_s26 }
  0x3c   : > { %v192_v5 = vrot.slane %v191_v4, 2 }
  0x3d   : > { %p414_p8 = por %p413_p5, %p412_p3 }
  0x3e   : > { %v193_v6 = vadd.f32 %v192_v5, %v191_v4 }
  0x3f   : > { %p415_p10 = pnand %p414_p8, %p408_p1 }
  0x40   : > { %v194_v7 = vrot.slane %v193_v6, 1 }
  0x42   : > { %v195_v8 = vadd.f32 %v194_v7, %v193_v6 }
  0x44   : > { %373 = vrsqrt.f32 %v195_v8  ;;  %vm199_vm1 = vcmp.eq.f32.partialorder %v195_v8, inf  ;;  %v202_v10 = vand.u32 2147483648, %v195_v8  ;;  %vm201_vm2 = vcmp.eq.f32.partialorder %v195_v8, 0.0 }
  0x51   : > { %v374_v9 = vpop.eup %373 }
  0x52   : > { %v198_v11 = vmul.f32 %v374_v9, %v195_v8 }
  0x54   : > { %v200_v12 = vsel %vm199_vm1, %v195_v8, %v198_v11 }
  0x55   : > { %v203_v13 = vsel %vm201_vm2, %v202_v10, %v200_v12 }
  0x56   : > { %v204_v14 = vsel %vm188_vm0, %v203_v13, 0.0 }
  0x57   : > { %205 = vadd.xlane.f32.xlu0 %v204_v14 }
  0xe0   : > { %v206_v15 = vpop.xlane.xlu0 %205 }
  0xe1   : > { %v207_v16 = vmul.f32 0.03125, %v206_v15 }
  0xe3   : > { %v208_v17 = vadd.f32 1e-06, %v207_v16 }
  0xe5   : > { %375 = vrcp.f32 %v208_v17 }
  0xf2   : > { %v376_v20 = vpop.eup %375 }
  0xf3   : > { %v210_v22 = vmul.f32 %v376_v20, %v203_v13 }
  0xf5   : > { %v212_v23 = vmul.f32 %v211_v21, %v210_v22 }
  0xf7   : > { %v213_v25 = vadd.f32 1.0, %v212_v23 }
  0xf9   : > { %v219_v26 = vrot.slane %v213_v25, %v218_v24 }
  0xfb   : > { %v221_v28 = vmul.f32 %v219_v26, %v186_v0 }
  0xfd   : > { %v228_v29 = vadd.f32 %v322_v27, %v221_v28 }
  0xff   : > { %229 = vst.msk [vmem:[%s185_s10] sm:$0xff] %vm188_vm0, %v228_v29 }
 0x100   : > { %418 = shalt.err (!%p415_p10)
}
 0x101   : > { %s419_s30 = scalar_lea.hbm %s242_s20, 128  ;;  %s423_s7 = scalar_lea.hbm %s650_s3, 256 }
 0x102   : > { %p420_p2 = scmp.ne.s32.totalorder %s242_s20, %s419_s30  ;;  %p424_p7 = scmp.lt.s32.totalorder %s242_s20, %s650_s3 }
 0x103   : > { %p425_p0 = scmp.lt.s32.totalorder %s423_s7, %s419_s30 }
 0x104   : > { %p421_p4 = pnand %p420_p2, %p661_p12 }
 0x105   : > { %p426_p6 = por %p425_p0, %p424_p7 }
 0x106   : > { %p422_p9 = pneg %p421_p4 }
 0x108   : > { %p427_p11 = pnand %p426_p6, %p422_p9 }
 0x10a   : > { %430 = shalt.err (!%p427_p11)
}
 0x10b   : > { %329 = dma.vmem_to_hbm [thread:$0]  (%p661_p12), %s245_s11, 128, %s242_s20, %s231_s22  }
 0x10c PF: > { %s256_s6 = sand.u32 1, %s457_s12   ;;  %p662_p13 = scmp.ne.s32.totalorder %s656_s25, 0 }
 0x10d   : > { %p663_p1 = scmp.ge.s32.totalorder %s469_s15, 2  ;;  %s257_s8 = scalar_lea.sflag [#allocation4], %s256_s6 }
 0x10f   : > { %p336_p3 = pnand %p663_p1, %p662_p13 }
 0x111   : > { %p337_p5 = pneg %p336_p3 }
 0x113   : > { %452 = dma.done.wait (%p337_p5), %s257_s8, 128  }
 0x114   : > { %454 = vsyncadd (%p337_p5), %s257_s8, 4294967168  ;;  %p16_p8 = scmp.ge.s32.totalorder %s518_s18, 4   ;;  %s664_s12 = smov %s461_s13 }
 0x115   : > { %s665_s13 = smov %s465_s14  ;;  %s666_s14 = smov %s530_s21 }
 0x116   : > { %s667_s15 = smov %s518_s18  ;;  %18 = sbr.rel (!%p16_p8) target bundleno = 5 (0x5), region = 77 }
 0x11b   :  { %262 = vsyncpa [#allocation3], 1 }
 0x11c   :  { %264 = vsyncpa [#allocation3 + $0x1], 1 }
 0x11d   :  { %265 = vsyncpa [#allocation4], 1 }
 0x11e   :  { %267 = vsyncpa [#allocation4 + $0x1], 1 }

</bundles_post_ra>
